<compile_context>
chip_gen: v6e
topology: v6e:2x2x1
jax: 0.10.0
libtpu: 0.0.40
codegen_flags: <defaults>
</compile_context>

<pallas_src>
import jax
import jax.numpy as jnp
from jax.experimental import pallas as pl
from jax.experimental.pallas import tpu as pltpu


def _make_c2fnam_kernel(W, c, C2, L, compute_dtype):
    """Kernel factory.  L = lane width of one grid block (whole images only)."""
    OFFS = tuple((dy, dx) for dy in (-1, 0, 1) for dx in (-1, 0, 1))

    def kernel(x_ref, mask_ref, wstk_ref, wc2_ref, bias_ref, o_ref,
               col_ref, cat_ref):
        xa = x_ref[...]                                     # (c, L) f32

        # Packed per-channel vectors: [b1(c) | b2(c) | bc2(C2) | na(C2) | nb(C2)].
        b1 = bias_ref[pl.ds(0, c), :]
        b2 = bias_ref[pl.ds(c, c), :]
        bc2 = bias_ref[pl.ds(2 * c, C2), :]
        na = bias_ref[pl.ds(2 * c + C2, C2), :]
        nb = bias_ref[pl.ds(2 * c + 2 * C2, C2), :]

        def conv3x3_im2col(z, w):
            # z: (c, L) f32.  Build the (9c, L) im2col matrix in VMEM scratch:
            # row block i holds spatial tap OFFS[i] of all c channels, with
            # out-of-image lanes zeroed (== nn.Conv2d padding=1 semantics).
            # Masks are per-image, so roll wrap across images is also zeroed.
            for i, (dy, dx) in enumerate(OFFS):
                off = dy * W + dx
                if off == 0:
                    tap = z
                else:
                    tap = (pltpu.roll(z, (-off) % L, axis=1)
                           * mask_ref[pl.ds(i, 1), :])
                col_ref[pl.ds(i * c, c), :] = tap.astype(compute_dtype)
            # One MXU matmul per conv, f32 accumulation.
            return jnp.dot(w, col_ref[...], preferred_element_type=jnp.float32)

        # cv2 input scratch: rows [0:c] = xa, rows [c:2c] = bottleneck output.
        cat_ref[pl.ds(0, c), :] = xa.astype(compute_dtype)

        # C2fBottleneck (shortcut=False -> no residual): two 3x3 Conv+BN+ReLU.
        h = jnp.maximum(conv3x3_im2col(xa, wstk_ref[0]) + b1, 0.0)
        h = jnp.maximum(conv3x3_im2col(h, wstk_ref[1]) + b2, 0.0)
        cat_ref[pl.ds(c, c), :] = h.astype(compute_dtype)

        # cv2: 1x1 Conv+BN+ReLU on concat([xa, h]) -- one MXU matmul.
        out = jnp.dot(wc2_ref[...], cat_ref[...],
                      preferred_element_type=jnp.float32) + bc2
        out = jnp.maximum(out, 0.0)                          # (C2, L) f32

        # NAM: sigmoid(BN(out) * weight_bn) * out, BN*weight_bn fused into na/nb.
        z = out * na + nb
        o_ref[...] = out * (0.5 * jnp.tanh(0.5 * z) + 0.5)   # sigmoid via EUP tanh

    return kernel


def c2fnam_pallas(x_nchw, c, w1, b1, w2, b2, wc2, bc2, na, nb,
                  *, compute_dtype=jnp.float32, n_lane_blocks=None):
    """x_nchw: (B, C1, H, W) f32.  Fused parameters:
       w1, w2 : (c, 9c) im2col 3x3 conv weights (BN scale folded in)
       b1, b2 : (c, 1) fused BN biases
       wc2    : (C2, 2c) 1x1 conv weight (BN folded);  bc2: (C2, 1)
       na, nb : (C2, 1) NAM fused scale / bias."""
    B, C1, H, W = x_nchw.shape
    HW = H * W
    C2 = wc2.shape[0]
    if n_lane_blocks is None:
        n_lane_blocks = 2 if B % 2 == 0 else 1
    assert B % n_lane_blocks == 0
    L = (B // n_lane_blocks) * HW            # lane width of one grid block
    L_full = B * HW

    # Only the first c channels are ever read (cv1 is unused by forward()): slice
    # them off so the dead half is never DMA'd, and fold batch into the lane axis.
    xa = jnp.transpose(x_nchw[:, :c].reshape(B, c, HW), (1, 0, 2)).reshape(c, L_full)

    # 9 per-image boundary masks (pure constants of H, W), tiled to block width.
    pos = jnp.arange(HW, dtype=jnp.int32)
    row, col = pos // W, pos % W
    masks = jnp.stack(
        [((row + dy >= 0) & (row + dy < H) & (col + dx >= 0) & (col + dx < W))
         for dy in (-1, 0, 1) for dx in (-1, 0, 1)]).astype(jnp.float32)
    masks = jnp.tile(masks, (1, L // HW))                        # (9, L)

    wstack = jnp.stack([w1, w2]).astype(compute_dtype)           # (2, c, 9c)
    wc2_k = wc2.astype(compute_dtype)                            # (C2, 2c)
    bias_pack = jnp.concatenate([b1, b2, bc2, na, nb], axis=0)   # (2c+3*C2, 1)

    kernel = _make_c2fnam_kernel(W, c, C2, L, compute_dtype)

    def full_spec(a):
        nd = a.ndim
        return pl.BlockSpec(a.shape, lambda g, _nd=nd: (0,) * _nd)

    out = pl.pallas_call(
        kernel,
        out_shape=jax.ShapeDtypeStruct((C2, L_full), jnp.float32),
        grid_spec=pltpu.PrefetchScalarGridSpec(
            num_scalar_prefetch=0,
            grid=(n_lane_blocks,),
            in_specs=[pl.BlockSpec((c, L), lambda g: (0, g)),
                      full_spec(masks),
                      full_spec(wstack),
                      full_spec(wc2_k),
                      full_spec(bias_pack)],
            out_specs=pl.BlockSpec((C2, L), lambda g: (0, g)),
            scratch_shapes=[pltpu.VMEM((9 * c, L), compute_dtype),   # im2col cols
                            pltpu.VMEM((2 * c, L), compute_dtype)],  # cv2 concat
        ),
        compiler_params=pltpu.CompilerParams(
            dimension_semantics=("parallel",)),
    )(xa, masks, wstack, wc2_k, bias_pack)

    out = jnp.transpose(out.reshape(C2, B, HW), (1, 0, 2))
    return out.reshape(B, C2, H, W)


def c2fnam_reference(x, c, eps, params):
    # Pure-JAX reference with raw (unfused) conv / BN parameters.
    (wb1, bn_b1, wb2, bn_b2, wc2, bn_c2, bn_nam) = params
    HIGH = jax.lax.Precision.HIGHEST

    def bn(y, p):
        g, be, mu, var = p
        s = g / jnp.sqrt(var + eps)
        return y * s[None, :, None, None] + (be - mu * s)[None, :, None, None]

    def conv3(z, w):
        return jax.lax.conv_general_dilated(
            z, w, (1, 1), ((1, 1), (1, 1)),
            dimension_numbers=('NCHW', 'OIHW', 'NCHW'), precision=HIGH)

    xa = x[:, :c]
    h = jnp.maximum(bn(conv3(xa, wb1), bn_b1), 0.0)
    h = jnp.maximum(bn(conv3(h, wb2), bn_b2), 0.0)
    cat = jnp.concatenate([xa, h], axis=1)
    out = jnp.einsum('bchw,oc->bohw', cat, wc2, precision=HIGH)
    out = jnp.maximum(bn(out, bn_c2), 0.0)
    g_n = bn_nam[0]
    z = bn(out, bn_nam)
    z = z * (jnp.abs(g_n) / jnp.sum(jnp.abs(g_n)))[None, :, None, None]
    return jax.nn.sigmoid(z) * out


if __name__ == "__main__":
    B, C1, H, W = 2, 4, 16, 16
    e = 0.5
    c = int(C1 * e)            # C2fNAM.c == 2
    C2 = 8                     # output channels
    eps = 1e-5

    key = jax.random.PRNGKey(0)
    ks = iter(jax.random.split(key, 32))

    x = jax.random.normal(next(ks), (B, C1, H, W), jnp.float32)

    def bn_params(ch, gamma_signed=False):
        if gamma_signed:
            g = jax.random.normal(next(ks), (ch,), jnp.float32) * 0.8 + 0.2
        else:
            g = jax.random.uniform(next(ks), (ch,), jnp.float32, 0.6, 1.4)
        be = jax.random.normal(next(ks), (ch,), jnp.float32) * 0.1
        mu = jax.random.normal(next(ks), (ch,), jnp.float32) * 0.1
        var = jax.random.uniform(next(ks), (ch,), jnp.float32, 0.8, 1.2)
        return (g, be, mu, var)

    # Raw (PyTorch-layout) parameters.
    wb1_pt = jax.random.normal(next(ks), (c, c, 3, 3), jnp.float32) * 0.3
    bn_b1 = bn_params(c)
    wb2_pt = jax.random.normal(next(ks), (c, c, 3, 3), jnp.float32) * 0.3
    bn_b2 = bn_params(c)
    wc2_pt = jax.random.normal(next(ks), (C2, 2 * c), jnp.float32) * 0.3
    bn_c2 = bn_params(C2)
    bn_nam = bn_params(C2, gamma_signed=True)   # NAM gamma may be negative

    # ---- fuse eval-mode BN into conv weights / per-channel biases ----
    def fuse_bn(p):
        g, be, mu, var = p
        s = g / jnp.sqrt(var + eps)
        return s, be - mu * s

    def fuse_conv3x3(w_pt, p):
        # (Cout,Cin,3,3) + BN -> im2col weight (Cout, 9*Cin); column layout is
        # (tap i = ky*3+kx major, input channel minor) to match the kernel scratch.
        s, b = fuse_bn(p)
        wf = w_pt * s[:, None, None, None]
        w9 = jnp.transpose(wf, (0, 2, 3, 1)).reshape(w_pt.shape[0],
                                                     9 * w_pt.shape[1])
        return w9, b.reshape(-1, 1)

    w1, b1 = fuse_conv3x3(wb1_pt, bn_b1)
    w2, b2 = fuse_conv3x3(wb2_pt, bn_b2)

    s_c2, b_c2 = fuse_bn(bn_c2)
    wc2 = wc2_pt * s_c2[:, None]
    bc2 = b_c2.reshape(-1, 1)

    s_n, b_n = fuse_bn(bn_nam)
    wbn = jnp.abs(bn_nam[0]) / jnp.sum(jnp.abs(bn_nam[0]))
    na = (s_n * wbn).reshape(-1, 1)
    nb = (b_n * wbn).reshape(-1, 1)

    ref = c2fnam_reference(x, c, eps,
                           (wb1_pt, bn_b1, wb2_pt, bn_b2, wc2_pt, bn_c2, bn_nam))

    # f32 path: two image-aligned lane blocks (grid=(2,) "parallel" -> both v7x TCs).
    out32 = c2fnam_pallas(x, c, w1, b1, w2, b2, wc2, bc2, na, nb,
                          compute_dtype=jnp.float32, n_lane_blocks=2)
    out32 = jax.block_until_ready(out32)
    assert out32.shape == (B, C2, H, W)
    err32 = float(jnp.max(jnp.abs(out32 - ref)))
    assert jnp.allclose(out32, ref, atol=3e-3, rtol=3e-3), err32

    # bf16-MXU-operand path, single folded block (both images on one lane axis):
    # regression test for cross-image roll-wrap masking; f32 accumulation, looser tol.
    out16 = c2fnam_pallas(x, c, w1, b1, w2, b2, wc2, bc2, na, nb,
                          compute_dtype=jnp.bfloat16, n_lane_blocks=1)
    out16 = jax.block_until_ready(out16)
    err16 = float(jnp.max(jnp.abs(out16 - ref)))
    assert jnp.allclose(out16, ref, atol=1.5e-1, rtol=1e-1), err16

    print("KERNEL_OK")
</pallas_src>

<mosaic_0001>
module attributes {stable_mosaic.version = 11 : i64} {
  func.func @kernel(%arg0: i32, %arg1: memref<2x256xf32, #tpu.memory_space<vmem>>, %arg2: memref<9x256xf32, #tpu.memory_space<vmem>>, %arg3: memref<2x2x18xf32, #tpu.memory_space<vmem>>, %arg4: memref<8x4xf32, #tpu.memory_space<vmem>>, %arg5: memref<28x1xf32, #tpu.memory_space<vmem>>, %arg6: memref<8x256xf32, #tpu.memory_space<vmem>>, %arg7: memref<18x256xf32, #tpu.memory_space<vmem>>, %arg8: memref<4x256xf32, #tpu.memory_space<vmem>>) attributes {dimension_semantics = [#tpu.dimension_semantics<parallel>], iteration_bounds = array<i64: 2>, scalar_prefetch = 0 : i64, scratch_operands = 2 : i64, tpu.core_type = #tpu.core_type<tc>, window_params = [{transform_indices = @transform_0, window_bounds = array<i64: 2, 256>}, {pipeline_mode = #tpu.pipeline_mode<synchronous>, transform_indices = @transform_1, window_bounds = array<i64: 9, 256>}, {pipeline_mode = #tpu.pipeline_mode<synchronous>, transform_indices = @transform_2, window_bounds = array<i64: 2, 2, 18>}, {pipeline_mode = #tpu.pipeline_mode<synchronous>, transform_indices = @transform_3, window_bounds = array<i64: 8, 4>}, {pipeline_mode = #tpu.pipeline_mode<synchronous>, transform_indices = @transform_4, window_bounds = array<i64: 28, 1>}, {transform_indices = @transform_5, window_bounds = array<i64: 8, 256>}]} {
    %c0 = arith.constant 0 : index
    %c0_0 = arith.constant 0 : index
    %0 = vector.load %arg1[%c0, %c0_0] : memref<2x256xf32, #tpu.memory_space<vmem>>, vector<2x256xf32>
    %c0_1 = arith.constant 0 : index
    %c0_2 = arith.constant 0 : index
    %1 = vector.load %arg5[%c0_1, %c0_2] : memref<28x1xf32, #tpu.memory_space<vmem>>, vector<2x1xf32>
    %c2 = arith.constant 2 : index
    %c0_3 = arith.constant 0 : index
    %2 = vector.load %arg5[%c2, %c0_3] : memref<28x1xf32, #tpu.memory_space<vmem>>, vector<2x1xf32>
    %c4 = arith.constant 4 : index
    %c0_4 = arith.constant 0 : index
    %3 = vector.load %arg5[%c4, %c0_4] : memref<28x1xf32, #tpu.memory_space<vmem>>, vector<8x1xf32>
    %c12 = arith.constant 12 : index
    %c0_5 = arith.constant 0 : index
    %4 = vector.load %arg5[%c12, %c0_5] : memref<28x1xf32, #tpu.memory_space<vmem>>, vector<8x1xf32>
    %c20 = arith.constant 20 : index
    %c0_6 = arith.constant 0 : index
    %5 = vector.load %arg5[%c20, %c0_6] : memref<28x1xf32, #tpu.memory_space<vmem>>, vector<8x1xf32>
    %c0_7 = arith.constant 0 : index
    %c0_8 = arith.constant 0 : index
    %6 = vector.load %arg8[%c0_7, %c0_8] : memref<4x256xf32, #tpu.memory_space<vmem>>, vector<2x256xf32>
    tpu.vector_store %arg8[%c0_7, %c0_8], %0 {strides = array<i32>} : memref<4x256xf32, #tpu.memory_space<vmem>>, vector<2x256xf32>,
    %c0_9 = arith.constant 0 : index
    %c0_10 = arith.constant 0 : index
    %c0_11 = arith.constant 0 : index
    %7 = vector.load %arg3[%c0_9, %c0_10, %c0_11] : memref<2x2x18xf32, #tpu.memory_space<vmem>>, vector<1x2x18xf32>
    %8 = vector.shape_cast %7 : vector<1x2x18xf32> to vector<2x18xf32>
    %c17_i32 = arith.constant 17 : i32
    %9 = tpu.dynamic_rotate %0 by %c17_i32 dim 1 : vector<2x256xf32>, i32 -> vector<2x256xf32>
    %c0_12 = arith.constant 0 : index
    %c0_13 = arith.constant 0 : index
    %10 = vector.load %arg2[%c0_12, %c0_13] : memref<9x256xf32, #tpu.memory_space<vmem>>, vector<1x256xf32>
    %11 = vector.broadcast %10 : vector<1x256xf32> to vector<2x256xf32>
    %12 = arith.mulf %9, %11 : vector<2x256xf32>
    %c0_14 = arith.constant 0 : index
    %c0_15 = arith.constant 0 : index
    %13 = vector.load %arg7[%c0_14, %c0_15] : memref<18x256xf32, #tpu.memory_space<vmem>>, vector<2x256xf32>
    tpu.vector_store %arg7[%c0_14, %c0_15], %12 {strides = array<i32>} : memref<18x256xf32, #tpu.memory_space<vmem>>, vector<2x256xf32>,
    %c16_i32 = arith.constant 16 : i32
    %14 = tpu.dynamic_rotate %0 by %c16_i32 dim 1 : vector<2x256xf32>, i32 -> vector<2x256xf32>
    %c1 = arith.constant 1 : index
    %c0_16 = arith.constant 0 : index
    %15 = vector.load %arg2[%c1, %c0_16] : memref<9x256xf32, #tpu.memory_space<vmem>>, vector<1x256xf32>
    %16 = vector.broadcast %15 : vector<1x256xf32> to vector<2x256xf32>
    %17 = arith.mulf %14, %16 : vector<2x256xf32>
    %c2_17 = arith.constant 2 : index
    %c0_18 = arith.constant 0 : index
    %18 = vector.load %arg7[%c2_17, %c0_18] : memref<18x256xf32, #tpu.memory_space<vmem>>, vector<2x256xf32>
    tpu.vector_store %arg7[%c2_17, %c0_18], %17 {strides = array<i32>} : memref<18x256xf32, #tpu.memory_space<vmem>>, vector<2x256xf32>,
    %c15_i32 = arith.constant 15 : i32
    %19 = tpu.dynamic_rotate %0 by %c15_i32 dim 1 : vector<2x256xf32>, i32 -> vector<2x256xf32>
    %c2_19 = arith.constant 2 : index
    %c0_20 = arith.constant 0 : index
    %20 = vector.load %arg2[%c2_19, %c0_20] : memref<9x256xf32, #tpu.memory_space<vmem>>, vector<1x256xf32>
    %21 = vector.broadcast %20 : vector<1x256xf32> to vector<2x256xf32>
    %22 = arith.mulf %19, %21 : vector<2x256xf32>
    %c4_21 = arith.constant 4 : index
    %c0_22 = arith.constant 0 : index
    %23 = vector.load %arg7[%c4_21, %c0_22] : memref<18x256xf32, #tpu.memory_space<vmem>>, vector<2x256xf32>
    tpu.vector_store %arg7[%c4_21, %c0_22], %22 {strides = array<i32>} : memref<18x256xf32, #tpu.memory_space<vmem>>, vector<2x256xf32>,
    %c1_i32 = arith.constant 1 : i32
    %24 = tpu.dynamic_rotate %0 by %c1_i32 dim 1 : vector<2x256xf32>, i32 -> vector<2x256xf32>
    %c3 = arith.constant 3 : index
    %c0_23 = arith.constant 0 : index
    %25 = vector.load %arg2[%c3, %c0_23] : memref<9x256xf32, #tpu.memory_space<vmem>>, vector<1x256xf32>
    %26 = vector.broadcast %25 : vector<1x256xf32> to vector<2x256xf32>
    %27 = arith.mulf %24, %26 : vector<2x256xf32>
    %c6 = arith.constant 6 : index
    %c0_24 = arith.constant 0 : index
    %28 = vector.load %arg7[%c6, %c0_24] : memref<18x256xf32, #tpu.memory_space<vmem>>, vector<2x256xf32>
    tpu.vector_store %arg7[%c6, %c0_24], %27 {strides = array<i32>} : memref<18x256xf32, #tpu.memory_space<vmem>>, vector<2x256xf32>,
    %c8 = arith.constant 8 : index
    %c0_25 = arith.constant 0 : index
    %29 = vector.load %arg7[%c8, %c0_25] : memref<18x256xf32, #tpu.memory_space<vmem>>, vector<2x256xf32>
    tpu.vector_store %arg7[%c8, %c0_25], %0 {strides = array<i32>} : memref<18x256xf32, #tpu.memory_space<vmem>>, vector<2x256xf32>,
    %c255_i32 = arith.constant 255 : i32
    %30 = tpu.dynamic_rotate %0 by %c255_i32 dim 1 : vector<2x256xf32>, i32 -> vector<2x256xf32>
    %c5 = arith.constant 5 : index
    %c0_26 = arith.constant 0 : index
    %31 = vector.load %arg2[%c5, %c0_26] : memref<9x256xf32, #tpu.memory_space<vmem>>, vector<1x256xf32>
    %32 = vector.broadcast %31 : vector<1x256xf32> to vector<2x256xf32>
    %33 = arith.mulf %30, %32 : vector<2x256xf32>
    %c10 = arith.constant 10 : index
    %c0_27 = arith.constant 0 : index
    %34 = vector.load %arg7[%c10, %c0_27] : memref<18x256xf32, #tpu.memory_space<vmem>>, vector<2x256xf32>
    tpu.vector_store %arg7[%c10, %c0_27], %33 {strides = array<i32>} : memref<18x256xf32, #tpu.memory_space<vmem>>, vector<2x256xf32>,
    %c241_i32 = arith.constant 241 : i32
    %35 = tpu.dynamic_rotate %0 by %c241_i32 dim 1 : vector<2x256xf32>, i32 -> vector<2x256xf32>
    %c6_28 = arith.constant 6 : index
    %c0_29 = arith.constant 0 : index
    %36 = vector.load %arg2[%c6_28, %c0_29] : memref<9x256xf32, #tpu.memory_space<vmem>>, vector<1x256xf32>
    %37 = vector.broadcast %36 : vector<1x256xf32> to vector<2x256xf32>
    %38 = arith.mulf %35, %37 : vector<2x256xf32>
    %c12_30 = arith.constant 12 : index
    %c0_31 = arith.constant 0 : index
    %39 = vector.load %arg7[%c12_30, %c0_31] : memref<18x256xf32, #tpu.memory_space<vmem>>, vector<2x256xf32>
    tpu.vector_store %arg7[%c12_30, %c0_31], %38 {strides = array<i32>} : memref<18x256xf32, #tpu.memory_space<vmem>>, vector<2x256xf32>,
    %c240_i32 = arith.constant 240 : i32
    %40 = tpu.dynamic_rotate %0 by %c240_i32 dim 1 : vector<2x256xf32>, i32 -> vector<2x256xf32>
    %c7 = arith.constant 7 : index
    %c0_32 = arith.constant 0 : index
    %41 = vector.load %arg2[%c7, %c0_32] : memref<9x256xf32, #tpu.memory_space<vmem>>, vector<1x256xf32>
    %42 = vector.broadcast %41 : vector<1x256xf32> to vector<2x256xf32>
    %43 = arith.mulf %40, %42 : vector<2x256xf32>
    %c14 = arith.constant 14 : index
    %c0_33 = arith.constant 0 : index
    %44 = vector.load %arg7[%c14, %c0_33] : memref<18x256xf32, #tpu.memory_space<vmem>>, vector<2x256xf32>
    tpu.vector_store %arg7[%c14, %c0_33], %43 {strides = array<i32>} : memref<18x256xf32, #tpu.memory_space<vmem>>, vector<2x256xf32>,
    %c239_i32 = arith.constant 239 : i32
    %45 = tpu.dynamic_rotate %0 by %c239_i32 dim 1 : vector<2x256xf32>, i32 -> vector<2x256xf32>
    %c8_34 = arith.constant 8 : index
    %c0_35 = arith.constant 0 : index
    %46 = vector.load %arg2[%c8_34, %c0_35] : memref<9x256xf32, #tpu.memory_space<vmem>>, vector<1x256xf32>
    %47 = vector.broadcast %46 : vector<1x256xf32> to vector<2x256xf32>
    %48 = arith.mulf %45, %47 : vector<2x256xf32>
    %c16 = arith.constant 16 : index
    %c0_36 = arith.constant 0 : index
    %49 = vector.load %arg7[%c16, %c0_36] : memref<18x256xf32, #tpu.memory_space<vmem>>, vector<2x256xf32>
    tpu.vector_store %arg7[%c16, %c0_36], %48 {strides = array<i32>} : memref<18x256xf32, #tpu.memory_space<vmem>>, vector<2x256xf32>,
    %c0_37 = arith.constant 0 : index
    %c0_38 = arith.constant 0 : index
    %50 = vector.load %arg7[%c0_37, %c0_38] : memref<18x256xf32, #tpu.memory_space<vmem>>, vector<18x256xf32>
    %cst = arith.constant dense<0.000000e+00> : vector<2x256xf32>
    %51 = tpu.matmul %8, %50, %cst {dimension_numbers = #tpu.dot_dimension_numbers<[1], [0], [0], [1], [0, 0, 1, 1], [], []>} : vector<2x18xf32>, vector<18x256xf32>, vector<2x256xf32> -> vector<2x256xf32>
    %52 = vector.broadcast %1 : vector<2x1xf32> to vector<2x256xf32>
    %53 = arith.addf %51, %52 : vector<2x256xf32>
    %cst_39 = arith.constant 0.000000e+00 : f32
    %54 = vector.broadcast %cst_39 : f32 to vector<2x256xf32>
    %55 = arith.maximumf %53, %54 : vector<2x256xf32>
    %c1_40 = arith.constant 1 : index
    %c0_41 = arith.constant 0 : index
    %c0_42 = arith.constant 0 : index
    %56 = vector.load %arg3[%c1_40, %c0_41, %c0_42] : memref<2x2x18xf32, #tpu.memory_space<vmem>>, vector<1x2x18xf32>
    %57 = vector.shape_cast %56 : vector<1x2x18xf32> to vector<2x18xf32>
    %c17_i32_43 = arith.constant 17 : i32
    %58 = tpu.dynamic_rotate %55 by %c17_i32_43 dim 1 : vector<2x256xf32>, i32 -> vector<2x256xf32>
    %c0_44 = arith.constant 0 : index
    %c0_45 = arith.constant 0 : index
    %59 = vector.load %arg2[%c0_44, %c0_45] : memref<9x256xf32, #tpu.memory_space<vmem>>, vector<1x256xf32>
    %60 = vector.broadcast %59 : vector<1x256xf32> to vector<2x256xf32>
    %61 = arith.mulf %58, %60 : vector<2x256xf32>
    %c0_46 = arith.constant 0 : index
    %c0_47 = arith.constant 0 : index
    %62 = vector.load %arg7[%c0_46, %c0_47] : memref<18x256xf32, #tpu.memory_space<vmem>>, vector<2x256xf32>
    tpu.vector_store %arg7[%c0_46, %c0_47], %61 {strides = array<i32>} : memref<18x256xf32, #tpu.memory_space<vmem>>, vector<2x256xf32>,
    %c16_i32_48 = arith.constant 16 : i32
    %63 = tpu.dynamic_rotate %55 by %c16_i32_48 dim 1 : vector<2x256xf32>, i32 -> vector<2x256xf32>
    %c1_49 = arith.constant 1 : index
    %c0_50 = arith.constant 0 : index
    %64 = vector.load %arg2[%c1_49, %c0_50] : memref<9x256xf32, #tpu.memory_space<vmem>>, vector<1x256xf32>
    %65 = vector.broadcast %64 : vector<1x256xf32> to vector<2x256xf32>
    %66 = arith.mulf %63, %65 : vector<2x256xf32>
    %c2_51 = arith.constant 2 : index
    %c0_52 = arith.constant 0 : index
    %67 = vector.load %arg7[%c2_51, %c0_52] : memref<18x256xf32, #tpu.memory_space<vmem>>, vector<2x256xf32>
    tpu.vector_store %arg7[%c2_51, %c0_52], %66 {strides = array<i32>} : memref<18x256xf32, #tpu.memory_space<vmem>>, vector<2x256xf32>,
    %c15_i32_53 = arith.constant 15 : i32
    %68 = tpu.dynamic_rotate %55 by %c15_i32_53 dim 1 : vector<2x256xf32>, i32 -> vector<2x256xf32>
    %c2_54 = arith.constant 2 : index
    %c0_55 = arith.constant 0 : index
    %69 = vector.load %arg2[%c2_54, %c0_55] : memref<9x256xf32, #tpu.memory_space<vmem>>, vector<1x256xf32>
    %70 = vector.broadcast %69 : vector<1x256xf32> to vector<2x256xf32>
    %71 = arith.mulf %68, %70 : vector<2x256xf32>
    %c4_56 = arith.constant 4 : index
    %c0_57 = arith.constant 0 : index
    %72 = vector.load %arg7[%c4_56, %c0_57] : memref<18x256xf32, #tpu.memory_space<vmem>>, vector<2x256xf32>
    tpu.vector_store %arg7[%c4_56, %c0_57], %71 {strides = array<i32>} : memref<18x256xf32, #tpu.memory_space<vmem>>, vector<2x256xf32>,
    %c1_i32_58 = arith.constant 1 : i32
    %73 = tpu.dynamic_rotate %55 by %c1_i32_58 dim 1 : vector<2x256xf32>, i32 -> vector<2x256xf32>
    %c3_59 = arith.constant 3 : index
    %c0_60 = arith.constant 0 : index
    %74 = vector.load %arg2[%c3_59, %c0_60] : memref<9x256xf32, #tpu.memory_space<vmem>>, vector<1x256xf32>
    %75 = vector.broadcast %74 : vector<1x256xf32> to vector<2x256xf32>
    %76 = arith.mulf %73, %75 : vector<2x256xf32>
    %c6_61 = arith.constant 6 : index
    %c0_62 = arith.constant 0 : index
    %77 = vector.load %arg7[%c6_61, %c0_62] : memref<18x256xf32, #tpu.memory_space<vmem>>, vector<2x256xf32>
    tpu.vector_store %arg7[%c6_61, %c0_62], %76 {strides = array<i32>} : memref<18x256xf32, #tpu.memory_space<vmem>>, vector<2x256xf32>,
    %c8_63 = arith.constant 8 : index
    %c0_64 = arith.constant 0 : index
    %78 = vector.load %arg7[%c8_63, %c0_64] : memref<18x256xf32, #tpu.memory_space<vmem>>, vector<2x256xf32>
    tpu.vector_store %arg7[%c8_63, %c0_64], %55 {strides = array<i32>} : memref<18x256xf32, #tpu.memory_space<vmem>>, vector<2x256xf32>,
    %c255_i32_65 = arith.constant 255 : i32
    %79 = tpu.dynamic_rotate %55 by %c255_i32_65 dim 1 : vector<2x256xf32>, i32 -> vector<2x256xf32>
    %c5_66 = arith.constant 5 : index
    %c0_67 = arith.constant 0 : index
    %80 = vector.load %arg2[%c5_66, %c0_67] : memref<9x256xf32, #tpu.memory_space<vmem>>, vector<1x256xf32>
    %81 = vector.broadcast %80 : vector<1x256xf32> to vector<2x256xf32>
    %82 = arith.mulf %79, %81 : vector<2x256xf32>
    %c10_68 = arith.constant 10 : index
    %c0_69 = arith.constant 0 : index
    %83 = vector.load %arg7[%c10_68, %c0_69] : memref<18x256xf32, #tpu.memory_space<vmem>>, vector<2x256xf32>
    tpu.vector_store %arg7[%c10_68, %c0_69], %82 {strides = array<i32>} : memref<18x256xf32, #tpu.memory_space<vmem>>, vector<2x256xf32>,
    %c241_i32_70 = arith.constant 241 : i32
    %84 = tpu.dynamic_rotate %55 by %c241_i32_70 dim 1 : vector<2x256xf32>, i32 -> vector<2x256xf32>
    %c6_71 = arith.constant 6 : index
    %c0_72 = arith.constant 0 : index
    %85 = vector.load %arg2[%c6_71, %c0_72] : memref<9x256xf32, #tpu.memory_space<vmem>>, vector<1x256xf32>
    %86 = vector.broadcast %85 : vector<1x256xf32> to vector<2x256xf32>
    %87 = arith.mulf %84, %86 : vector<2x256xf32>
    %c12_73 = arith.constant 12 : index
    %c0_74 = arith.constant 0 : index
    %88 = vector.load %arg7[%c12_73, %c0_74] : memref<18x256xf32, #tpu.memory_space<vmem>>, vector<2x256xf32>
    tpu.vector_store %arg7[%c12_73, %c0_74], %87 {strides = array<i32>} : memref<18x256xf32, #tpu.memory_space<vmem>>, vector<2x256xf32>,
    %c240_i32_75 = arith.constant 240 : i32
    %89 = tpu.dynamic_rotate %55 by %c240_i32_75 dim 1 : vector<2x256xf32>, i32 -> vector<2x256xf32>
    %c7_76 = arith.constant 7 : index
    %c0_77 = arith.constant 0 : index
    %90 = vector.load %arg2[%c7_76, %c0_77] : memref<9x256xf32, #tpu.memory_space<vmem>>, vector<1x256xf32>
    %91 = vector.broadcast %90 : vector<1x256xf32> to vector<2x256xf32>
    %92 = arith.mulf %89, %91 : vector<2x256xf32>
    %c14_78 = arith.constant 14 : index
    %c0_79 = arith.constant 0 : index
    %93 = vector.load %arg7[%c14_78, %c0_79] : memref<18x256xf32, #tpu.memory_space<vmem>>, vector<2x256xf32>
    tpu.vector_store %arg7[%c14_78, %c0_79], %92 {strides = array<i32>} : memref<18x256xf32, #tpu.memory_space<vmem>>, vector<2x256xf32>,
    %c239_i32_80 = arith.constant 239 : i32
    %94 = tpu.dynamic_rotate %55 by %c239_i32_80 dim 1 : vector<2x256xf32>, i32 -> vector<2x256xf32>
    %c8_81 = arith.constant 8 : index
    %c0_82 = arith.constant 0 : index
    %95 = vector.load %arg2[%c8_81, %c0_82] : memref<9x256xf32, #tpu.memory_space<vmem>>, vector<1x256xf32>
    %96 = vector.broadcast %95 : vector<1x256xf32> to vector<2x256xf32>
    %97 = arith.mulf %94, %96 : vector<2x256xf32>
    %c16_83 = arith.constant 16 : index
    %c0_84 = arith.constant 0 : index
    %98 = vector.load %arg7[%c16_83, %c0_84] : memref<18x256xf32, #tpu.memory_space<vmem>>, vector<2x256xf32>
    tpu.vector_store %arg7[%c16_83, %c0_84], %97 {strides = array<i32>} : memref<18x256xf32, #tpu.memory_space<vmem>>, vector<2x256xf32>,
    %c0_85 = arith.constant 0 : index
    %c0_86 = arith.constant 0 : index
    %99 = vector.load %arg7[%c0_85, %c0_86] : memref<18x256xf32, #tpu.memory_space<vmem>>, vector<18x256xf32>
    %cst_87 = arith.constant dense<0.000000e+00> : vector<2x256xf32>
    %100 = tpu.matmul %57, %99, %cst_87 {dimension_numbers = #tpu.dot_dimension_numbers<[1], [0], [0], [1], [0, 0, 1, 1], [], []>} : vector<2x18xf32>, vector<18x256xf32>, vector<2x256xf32> -> vector<2x256xf32>
    %101 = vector.broadcast %2 : vector<2x1xf32> to vector<2x256xf32>
    %102 = arith.addf %100, %101 : vector<2x256xf32>
    %cst_88 = arith.constant 0.000000e+00 : f32
    %103 = vector.broadcast %cst_88 : f32 to vector<2x256xf32>
    %104 = arith.maximumf %102, %103 : vector<2x256xf32>
    %c2_89 = arith.constant 2 : index
    %c0_90 = arith.constant 0 : index
    %105 = vector.load %arg8[%c2_89, %c0_90] : memref<4x256xf32, #tpu.memory_space<vmem>>, vector<2x256xf32>
    tpu.vector_store %arg8[%c2_89, %c0_90], %104 {strides = array<i32>} : memref<4x256xf32, #tpu.memory_space<vmem>>, vector<2x256xf32>,
    %c0_91 = arith.constant 0 : index
    %c0_92 = arith.constant 0 : index
    %106 = vector.load %arg4[%c0_91, %c0_92] : memref<8x4xf32, #tpu.memory_space<vmem>>, vector<8x4xf32>
    %c0_93 = arith.constant 0 : index
    %c0_94 = arith.constant 0 : index
    %107 = vector.load %arg8[%c0_93, %c0_94] : memref<4x256xf32, #tpu.memory_space<vmem>>, vector<4x256xf32>
    %cst_95 = arith.constant dense<0.000000e+00> : vector<8x256xf32>
    %108 = tpu.matmul %106, %107, %cst_95 {dimension_numbers = #tpu.dot_dimension_numbers<[1], [0], [0], [1], [0, 0, 1, 1], [], []>} : vector<8x4xf32>, vector<4x256xf32>, vector<8x256xf32> -> vector<8x256xf32>
    %109 = vector.broadcast %3 : vector<8x1xf32> to vector<8x256xf32>
    %110 = arith.addf %108, %109 : vector<8x256xf32>
    %cst_96 = arith.constant 0.000000e+00 : f32
    %111 = vector.broadcast %cst_96 : f32 to vector<8x256xf32>
    %112 = arith.maximumf %110, %111 : vector<8x256xf32>
    %113 = vector.broadcast %4 : vector<8x1xf32> to vector<8x256xf32>
    %114 = arith.mulf %112, %113 : vector<8x256xf32>
    %115 = vector.broadcast %5 : vector<8x1xf32> to vector<8x256xf32>
    %116 = arith.addf %114, %115 : vector<8x256xf32>
    %cst_97 = arith.constant 5.000000e-01 : f32
    %117 = vector.broadcast %cst_97 : f32 to vector<8x256xf32>
    %118 = arith.mulf %117, %116 : vector<8x256xf32>
    %119 = math.tanh %118 : vector<8x256xf32>
    %cst_98 = arith.constant 5.000000e-01 : f32
    %120 = vector.broadcast %cst_98 : f32 to vector<8x256xf32>
    %121 = arith.mulf %120, %119 : vector<8x256xf32>
    %cst_99 = arith.constant 5.000000e-01 : f32
    %122 = vector.broadcast %cst_99 : f32 to vector<8x256xf32>
    %123 = arith.addf %121, %122 : vector<8x256xf32>
    %124 = arith.mulf %112, %123 : vector<8x256xf32>
    %c0_100 = arith.constant 0 : index
    %c0_101 = arith.constant 0 : index
    %125 = vector.load %arg6[%c0_100, %c0_101] : memref<8x256xf32, #tpu.memory_space<vmem>>, vector<8x256xf32>
    tpu.vector_store %arg6[%c0_100, %c0_101], %124 {strides = array<i32>} : memref<8x256xf32, #tpu.memory_space<vmem>>, vector<8x256xf32>,
    return
  }
  func.func @transform_0(%arg0: i32) -> (i32, i32) {
    %c0_i32 = arith.constant 0 : i32
    %c0_i32_0 = arith.constant 0 : i32
    return %c0_i32, %arg0 : i32, i32
  }
  func.func @transform_1(%arg0: i32) -> (i32, i32) {
    %c0_i32 = arith.constant 0 : i32
    %c0_i32_0 = arith.constant 0 : i32
    %c0_i32_1 = arith.constant 0 : i32
    return %c0_i32, %c0_i32_0 : i32, i32
  }
  func.func @transform_2(%arg0: i32) -> (i32, i32, i32) {
    %c0_i32 = arith.constant 0 : i32
    %c0_i32_0 = arith.constant 0 : i32
    %c0_i32_1 = arith.constant 0 : i32
    %c0_i32_2 = arith.constant 0 : i32
    return %c0_i32, %c0_i32_0, %c0_i32_1 : i32, i32, i32
  }
  func.func @transform_3(%arg0: i32) -> (i32, i32) {
    %c0_i32 = arith.constant 0 : i32
    %c0_i32_0 = arith.constant 0 : i32
    %c0_i32_1 = arith.constant 0 : i32
    return %c0_i32, %c0_i32_0 : i32, i32
  }
  func.func @transform_4(%arg0: i32) -> (i32, i32) {
    %c0_i32 = arith.constant 0 : i32
    %c0_i32_0 = arith.constant 0 : i32
    %c0_i32_1 = arith.constant 0 : i32
    return %c0_i32, %c0_i32_0 : i32, i32
  }
  func.func @transform_5(%arg0: i32) -> (i32, i32) {
    %c0_i32 = arith.constant 0 : i32
    %c0_i32_0 = arith.constant 0 : i32
    return %c0_i32, %arg0 : i32, i32
  }
}

</mosaic_0001>

<bundles_post_ra>
// kernel: tpu_custom_call.1
= control target key start
LH: loop header
LB: loop body
LE: loop exit
PB: predicated region body
PF: predicated region fallthrough
CT: control target
= control target key end

     0   :  { %10 = vsyncpa [#allocation5], 0  ;;  %s1583_s0 = inlined_call_operand.vmem [shape: f32[2,512], index: 0, kind: input, shape index: {}]   ;;  %s1584_s1 = inlined_call_operand.vmem [shape: f32[9,256], index: 1, kind: input, shape index: {}]   ;;  %s1585_s2 = inlined_call_operand.vmem [shape: f32[2,2,18], index: 2, kind: input, shape index: {}]   ;;  %s1586_s3 = inlined_call_operand.vmem [shape: f32[8,4], index: 3, kind: input, shape index: {}]   ;;  %s1587_s4 = inlined_call_operand.vmem [shape: f32[28,1], index: 4, kind: input, shape index: {}]   ;;  %s1588_s5 = inlined_call_operand.hbm [shape: f32[8,512], index: 5, kind: output, shape index: {}]  }
   0x1   :  { %12 = vsyncpa [#allocation5 + $0x1], 0  ;;  %s1274_s18 = smov 0   ;;  %s1276_s19 = smov 0  }
   0x2   :  { %s1278_s20 = smov 0   ;;  %s1280_s21 = smov 0  }
   0x3 LB: > { %s1295_s22 = sadd.s32 4294967295, %s1231_s21   ;;  %s1077_s23 = sadd.s32 4294967294, %s1231_s21   ;;  %s1231_s21 = sphi %s1280_s21, %s1594_s21   ;;  %s1227_s20 = sphi %s1278_s20, %s1593_s20   ;;  %s1223_s19 = sphi %s1276_s19, %s1592_s19   ;;  %s1219_s18 = sphi %s1274_s18, %s1591_s18  }
   0x4   : > { %s1299_s24 = sadd.s32 1, %s1231_s21   ;;  %s135_s25 = sadd.s32 1, %s1227_s20 }
   0x5   : > { %s132_s26 = ssub.s32 %s1231_s21, %s1299_s24  ;;  %p145_p0 = scmp.ne.s32.totalorder %s1227_s20, %s1223_s19 }
   0x6   : > { %p133_p1 = scmp.eq.s32.totalorder %s132_s26, 0  ;;  %p146_p2 = scmp.eq.s32.totalorder %s1295_s22, 1 }
   0x7   : > { %p151_p3 = scmp.ne.s32.totalorder %s1223_s19, %s1219_s18  ;;  %p152_p4 = scmp.eq.s32.totalorder %s1077_s23, 1 }
   0x8   : > { %s1310_s27 = scalar_select %p133_p1, %s1227_s20, %s135_s25  }
   0x9   : > { %p1312_p5 = por %p146_p2, %p145_p0  ;;  %p1316_p6 = por %p152_p4, %p151_p3 }
   0xa   : > { %p1080_p7 = scmp.ge.s32.totalorder %s1231_s21, 1  ;;  %p191_p8 = scmp.lt.s32.totalorder %s1231_s21, 3 }
   0xc   : > { %p192_p9 = pnand %p1080_p7, %p191_p8 }
   0xd   : > { %s1082_s30 = sshll.u32 (!%p192_p9), %s1295_s22, 1  ;;  %s1233_s10 = smov (!%p192_p9), 113  }
   0xe   : > { %195 = sbr.rel (%p192_p9) target bundleno = 989 (0x3dd), region = 40  ;;  %p220_p10 = scmp.lt.s32.totalorder (!%p192_p9), %s1082_s30, 3 }
   0xf   : > { %s1234_s11 = smov (!%p192_p9), 127   ;;  %s1235_s12 = smov (!%p192_p9), 112  }
  0x10   : > { %s1236_s13 = smov (!%p192_p9), 111   ;;  %s1237_s14 = smov (!%p192_p9), 16  }
  0x11   : > { %s1238_s15 = smov (!%p192_p9), 15   ;;  %s1239_s16 = smov (!%p192_p9), 1  }
  0x12   : > { %s1241_s17 = smov (!%p192_p9), 17   ;;  %s216_s23 = sand.u32 (!%p192_p9), 1, %s1223_s19  }
  0x13   : > { %s1596_s30 = smov (!%p220_p10, %s1082_s30), 3  ;;  %v1240_v2 = vmov 0.0   ;;  %v1242_v3 = vmov 0   ;;  %v227_v4 = vld [vmem:[%s1587_s4] sm:$0x3]  ;;  %v249_v5 = vlaneseq  ;;  %vm491_vm6 = vcmask 1041408  }
  0x14   : > { %s1083_s6 = sshll.u32 %s1596_s30, 1  ;;  %562 = vmatprep.mubr.f32.mxu0 %v1240_v2  ;;  %871 = vmatprep.mubr.f32.mxu1 %v1240_v2  ;;  %v1089_v10 = vld [vmem:[%s1584_s1 + $0x6] ss:$8 sm:$0x3]  ;;  %vm487_vm9 = vcmask 146432   ;;  %vm899_vm10 = vcmask 1043456  }
  0x15   : > { %s223_s9 = scalar_lea.vmem %s1583_s0, %s1083_s6  ;;  %1164 = vset.pattern.permute.xlu0 %v1242_v3  ;;  %1165 = vset.pattern.permute.xlu1 %v1242_v3  ;;  %v257_v6 = vshrl.u32 %v249_v5, 7  ;;  %v1347_v7 = vand.u32 127, %v249_v5  ;;  %v1090_v15 = vld [vmem:[%s1584_s1 + $0x7] ss:$8 sm:$0x3]  ;;  %vm895_vm11 = vcmask 31744  }
  0x16   : > { %v1084_v0 = vld.sshfl [vmem:[%s223_s9] sm:$0x33 pattern:$0x76325410]  ;;  %s1081_s25 = sshll.u32 %s216_s23, 4  ;;  %s1114_s26 = sshll.u32 %s1295_s22, 8 }
  0x17   : > { %392 = vrot.lane.b32.xlu1 %v1084_v0, %s1233_s10  ;;  %241 = vst [vmem:[#allocation3] sm:$0x33] %v1084_v0  ;;  %360 = vst [vmem:[#allocation2 + $0x8] sm:$0x3] %v1084_v0  ;;  %362 = vrot.lane.b32.xlu0 %v1084_v0, %s1234_s11  ;;  %v243_v1 = vcombine.high %v1084_v0, %v1084_v0  ;;  %v1349_v8 = vsub.s32 0, %v257_v6  ;;  %v1351_v9 = vsub.s32 1, %v257_v6 }
  0x18   : > { %vm396_vm0 = vcmp.lt.s32.totalorder %v1347_v7, 113  ;;  %v1088_v16 = vld [vmem:[%s1584_s1 + $0x5] ss:$8 sm:$0x3]  ;;  %vm426_vm1 = vcmp.lt.s32.totalorder %v1347_v7, 112  ;;  %vm366_vm2 = vcmp.lt.s32.totalorder %v1347_v7, 127 }
  0x19   : > { %361 = vst [vmem:[#allocation2] sm:$0x3] %v243_v1  ;;  %v405_v13 = vrot.slane %v1089_v10, %v1349_v8  ;;  %v409_v14 = vrot.slane %v1089_v10, %v1351_v9  ;;  %v435_v21 = vrot.slane %v1090_v15, %v1349_v8  ;;  %v439_v22 = vrot.slane %v1090_v15, %v1351_v9  ;;  %v1091_v23 = vld [vmem:[%s1584_s1 + $0x10] ss:$8 sm:$0x3]  ;;  %s218_s30 = scalar_lea.vmem [#allocation4], %s1081_s25 }
  0x1a   : > { %v375_v26 = vrot.slane %v1088_v16, %v1349_v8  ;;  %v379_v27 = vrot.slane %v1088_v16, %v1351_v9  ;;  %vm456_vm3 = vcmp.lt.s32.totalorder %v1347_v7, 111  ;;  %v465_v32 = vrot.slane %v1091_v23, %v1349_v8  ;;  %v1085_v42 = vld [vmem:[%s1584_s1 + $0x1] ss:$8 sm:$0x3] }
  0x1b   : > { %422 = vrot.lane.b32.xlu0 %v1084_v0, %s1235_s12  ;;  %394 = vrot.lane.b32.xlu1 %v243_v1, %s1233_s10  ;;  %v469_v33 = vrot.slane %v1091_v23, %v1351_v9  ;;  %vm274_vm4 = vcmp.lt.s32.totalorder %v1347_v7, 16  ;;  %v283_v53 = vrot.slane %v1085_v42, %v1349_v8  ;;  %v287_v54 = vrot.slane %v1085_v42, %v1351_v9  ;;  %v1086_v55 = vld [vmem:[%s1584_s1 + $0x2] ss:$8 sm:$0x3] }
  0x1c   : > { %vm304_vm5 = vcmp.lt.s32.totalorder %v1347_v7, 15  ;;  %v313_v62 = vrot.slane %v1086_v55, %v1349_v8  ;;  %v317_v63 = vrot.slane %v1086_v55, %v1351_v9  ;;  %vm334_vm7 = vcmp.lt.s32.totalorder %v1347_v7, 1  ;;  %v254_v15 = vld [vmem:[%s1584_s1] ss:$8 sm:$0x3] }
  0x1d   : > { %vm251_vm8 = vcmp.lt.s32.totalorder %v1347_v7, 17  ;;  %v229_v7 = vld [vmem:[%s1587_s4 + $0x4] sm:$0xff] }
  0x1f   : > { %424 = vrot.lane.b32.xlu1 %v243_v1, %s1235_s12  ;;  %364 = vrot.lane.b32.xlu0 %v243_v1, %s1234_s11 }
  0x23   : > { %454 = vrot.lane.b32.xlu1 %v243_v1, %s1236_s13  ;;  %452 = vrot.lane.b32.xlu0 %v1084_v0, %s1236_s13 }
  0x27   : > { %272 = vrot.lane.b32.xlu1 %v243_v1, %s1237_s14  ;;  %270 = vrot.lane.b32.xlu0 %v1084_v0, %s1237_s14 }
  0x2b   : > { %302 = vrot.lane.b32.xlu1 %v243_v1, %s1238_s15  ;;  %300 = vrot.lane.b32.xlu0 %v1084_v0, %s1238_s15 }
  0x2f   : > { %332 = vrot.lane.b32.xlu1 %v243_v1, %s1239_s16  ;;  %330 = vrot.lane.b32.xlu0 %v1084_v0, %s1239_s16 }
  0x33   : > { %247 = vrot.lane.b32.xlu1 %v243_v1, %s1241_s17  ;;  %245 = vrot.lane.b32.xlu0 %v1084_v0, %s1241_s17  ;;  %v1087_v0 = vld [vmem:[%s1584_s1 + $0x3] ss:$8 sm:$0x3] }
  0x37   : > { %484 = vperm.xlu0 %1164, %v227_v4  }
  0x89   : > { %v393_v11 = vpop.permute.xlu1 %392  ;;  %v363_v12 = vpop.permute.xlu0 %362 }
  0x8d   : > { %v423_v17 = vpop.permute.xlu0 %422  ;;  %v395_v18 = vpop.permute.xlu1 %394 }
  0x8e   : > { %v397_v19 = vsel %vm396_vm0, %v393_v11, %v395_v18  ;;  %v398_v20 = vsel %vm396_vm0, %v395_v18, %v393_v11 }
  0x8f   : > { %v412_v24 = vmul.f32 %v405_v13, %v397_v19  ;;  %v413_v25 = vmul.f32 %v409_v14, %v398_v20  ;;  %v343_v13 = vrot.slane %v1087_v0, %v1349_v8  ;;  %v347_v14 = vrot.slane %v1087_v0, %v1351_v9 }
  0x91   : > { %v416_v28 = vrot.slane %v412_v24, 4  ;;  %v417_v29 = vrot.slane %v413_v25, 4  ;;  %v425_v30 = vpop.permute.xlu1 %424  ;;  %v365_v31 = vpop.permute.xlu0 %364 }
  0x92   : > { %v427_v34 = vsel %vm426_vm1, %v423_v17, %v425_v30  ;;  %v428_v35 = vsel %vm426_vm1, %v425_v30, %v423_v17  ;;  %v367_v36 = vsel %vm366_vm2, %v363_v12, %v365_v31  ;;  %v368_v37 = vsel %vm366_vm2, %v365_v31, %v363_v12 }
  0x93   : > { %420 = vst [vmem:[#allocation2 + $0x8] sm:$0x30] %v416_v28  ;;  %421 = vst [vmem:[#allocation2] sm:$0x30] %v417_v29  ;;  %v442_v38 = vmul.f32 %v435_v21, %v427_v34  ;;  %v443_v39 = vmul.f32 %v439_v22, %v428_v35  ;;  %v382_v40 = vmul.f32 %v375_v26, %v367_v36 }
  0x94   : > { %v383_v41 = vmul.f32 %v379_v27, %v368_v37  ;;  %v259_v28 = vrot.slane %v254_v15, %v1349_v8  ;;  %v263_v29 = vrot.slane %v254_v15, %v1351_v9 }
  0x95   : > { %v446_v43 = vrot.slane %v442_v38, 2  ;;  %v447_v44 = vrot.slane %v443_v39, 2  ;;  %v386_v45 = vrot.slane %v382_v40, 6  ;;  %v455_v47 = vpop.permute.xlu1 %454  ;;  %v453_v48 = vpop.permute.xlu0 %452  ;;  %v242_v40 = vld [vmem:[%s1585_s2] sm:$0x3] }
  0x96   : > { %v387_v46 = vrot.slane %v383_v41, 6  ;;  %v457_v49 = vsel %vm456_vm3, %v453_v48, %v455_v47  ;;  %v458_v50 = vsel %vm456_vm3, %v455_v47, %v453_v48  ;;  %v230_v48 = vld [vmem:[%s1587_s4 + $0xc] sm:$0xff] }
  0x97   : > { %450 = vst [vmem:[#allocation2 + $0x8] sm:$0xc0] %v446_v43  ;;  %451 = vst [vmem:[#allocation2] sm:$0xc0] %v447_v44  ;;  %v472_v51 = vmul.f32 %v465_v32, %v457_v49  ;;  %v473_v52 = vmul.f32 %v469_v33, %v458_v50 }
  0x98   : > { %390 = vst [vmem:[#allocation2 + $0x8] sm:$0xc] %v386_v45  ;;  %391 = vst [vmem:[#allocation2] sm:$0xc] %v387_v46 }
  0x99   : > { %474 = vst [vmem:[#allocation2 + $0x18] sm:$0x3] %v472_v51  ;;  %475 = vst [vmem:[#allocation2 + $0x20] sm:$0x3] %v473_v52  ;;  %v273_v56 = vpop.permute.xlu1 %272  ;;  %v271_v57 = vpop.permute.xlu0 %270 }
  0x9a   : > { %v275_v58 = vsel %vm274_vm4, %v271_v57, %v273_v56  ;;  %v276_v59 = vsel %vm274_vm4, %v273_v56, %v271_v57  ;;  %v1099_v49 = vld [vmem:[%s1584_s1 + $0x5] ss:$8 sm:$0x3] }
  0x9b   : > { %v290_v60 = vmul.f32 %v283_v53, %v276_v59  ;;  %v291_v61 = vmul.f32 %v287_v54, %v275_v58  ;;  %v692_v52 = vrot.slane %v1099_v49, %v1349_v8  ;;  %v696_v53 = vrot.slane %v1099_v49, %v1351_v9  ;;  %v1100_v54 = vld [vmem:[%s1584_s1 + $0x6] ss:$8 sm:$0x3] }
  0x9d   : > { %v294_v1 = vrot.slane %v290_v60, 6  ;;  %v295_v3 = vrot.slane %v291_v61, 6  ;;  %v303_v4 = vpop.permute.xlu1 %302  ;;  %v301_v5 = vpop.permute.xlu0 %300  ;;  %v720_v61 = vrot.slane %v1100_v54, %v1349_v8 }
  0x9e   : > { %v305_v6 = vsel %vm304_vm5, %v301_v5, %v303_v4  ;;  %v306_v10 = vsel %vm304_vm5, %v303_v4, %v301_v5 }
  0x9f   : > { %298 = vst [vmem:[#allocation2 + $0x28] sm:$0xc] %v294_v1  ;;  %299 = vst [vmem:[#allocation2 + $0x10] sm:$0xc] %v295_v3  ;;  %v320_v11 = vmul.f32 %v313_v62, %v306_v10  ;;  %v321_v12 = vmul.f32 %v317_v63, %v305_v6  ;;  %v479_v24 = vld [vmem:[#allocation2] sm:$0xff]  ;;  %v478_v27 = vld [vmem:[#allocation2 + $0x8] sm:$0xff]  ;;  %v724_v62 = vrot.slane %v1100_v54, %v1351_v9 }
  0xa0   : > { %v481_v16 = vld [vmem:[#allocation2 + $0x20] sm:$0x3]  ;;  %v480_v17 = vld [vmem:[#allocation2 + $0x18] sm:$0x3] }
  0xa1   : > { %v324_v18 = vrot.slane %v320_v11, 4  ;;  %v325_v19 = vrot.slane %v321_v12, 4  ;;  %v333_v20 = vpop.permute.xlu1 %332  ;;  %1092 = vmatprep.subr.msk.mxu0 %vm491_vm6, %v481_v16  ;;  %v331_v21 = vpop.permute.xlu0 %330  ;;  %v1101_v63 = vld [vmem:[%s1584_s1 + $0x7] ss:$8 sm:$0x3] }
  0xa2   : > { %v335_v22 = vsel %vm334_vm7, %v331_v21, %v333_v20  ;;  %v336_v23 = vsel %vm334_vm7, %v333_v20, %v331_v21  ;;  %1093 = vmatpush1.msk.msra.mxu0 %vm491_vm6, %v480_v17  ;;  %v748_v12 = vrot.slane %v1101_v63, %v1349_v8  ;;  %v579_v54 = vld [vmem:[%s1584_s1] ss:$8 sm:$0x3] }
  0xa3   : > { %328 = vst [vmem:[#allocation2 + $0x28] sm:$0x30] %v324_v18  ;;  %329 = vst [vmem:[#allocation2 + $0x10] sm:$0x30] %v325_v19  ;;  %v350_v25 = vmul.f32 %v343_v13, %v336_v23  ;;  %v351_v26 = vmul.f32 %v347_v14, %v335_v22  ;;  %526 = vmatprep.subr.mxu0 %v479_v24  ;;  %v752_v13 = vrot.slane %v1101_v63, %v1351_v9 }
  0xa4   : > { %527 = vmatpush1.msra.mxu0 %v478_v27  ;;  %v1102_v14 = vld [vmem:[%s1584_s1 + $0x10] ss:$8 sm:$0x3] }
  0xa5   : > { %v354_v30 = vrot.slane %v350_v25, 2  ;;  %v355_v31 = vrot.slane %v351_v26, 2  ;;  %v248_v32 = vpop.permute.xlu1 %247  ;;  %v246_v33 = vpop.permute.xlu0 %245  ;;  %v776_v23 = vrot.slane %v1102_v14, %v1349_v8  ;;  %v780_v24 = vrot.slane %v1102_v14, %v1351_v9  ;;  %v1096_v25 = vld [vmem:[%s1584_s1 + $0x1] ss:$8 sm:$0x3] }
  0xa6   : > { %v252_v34 = vsel %vm251_vm8, %v246_v33, %v248_v32  ;;  %v253_v35 = vsel %vm251_vm8, %v248_v32, %v246_v33  ;;  %v606_v33 = vrot.slane %v1096_v25, %v1349_v8 }
  0xa7   : > { %358 = vst [vmem:[#allocation2 + $0x28] sm:$0xc0] %v354_v30  ;;  %359 = vst [vmem:[#allocation2 + $0x10] sm:$0xc0] %v355_v31  ;;  %v266_v36 = vmul.f32 %v259_v28, %v253_v35  ;;  %v267_v37 = vmul.f32 %v263_v29, %v252_v34  ;;  %v610_v34 = vrot.slane %v1096_v25, %v1351_v9 }
  0xa8   : > { %v1097_v35 = vld [vmem:[%s1584_s1 + $0x2] ss:$8 sm:$0x3] }
  0xa9   : > { %268 = vst [vmem:[#allocation2 + $0x28] sm:$0x3] %v266_v36  ;;  %269 = vst [vmem:[#allocation2 + $0x10] sm:$0x3] %v267_v37 }
  0xb0   : > { %v477_v38 = vld [vmem:[#allocation2 + $0x10] sm:$0xff]  ;;  %v476_v39 = vld [vmem:[#allocation2 + $0x28] sm:$0xff] }
  0xb1   : > { %528 = vmatprep.subr.mxu0 %v477_v38 }
  0xb2   : > { %529 = vmatpush1.msra.mxu0 %v476_v39  ;;  %v485_v41 = vpop.permute.xlu0 %484 }
  0xb3   : > { %1094 = vmatmul.mubr.msk.f32.vlgmr.msra.gmra.mxu0 %vm487_vm9, %v242_v40 }
  0xb4   : > { %968 = vmatprep.mubr.f32.mxu0 %v1240_v2  ;;  %v228_v2 = vld [vmem:[%s1587_s4 + $0x2] sm:$0x3] }
 0x173   : > { %v564_v42 = vpop.f32.mrf.mxu0 }
 0x174   : > { %v565_v43 = vadd.f32 %v564_v42, %v485_v41  ;;  %v634_v42 = vrot.slane %v1097_v35, %v1349_v8 }
 0x175   : > { %v566_v44 = vpop.f32.mrf.mxu0 }
 0x176   : > { %v569_v45 = vmax.f32 %v565_v43, 0.0  ;;  %v567_v46 = vadd.f32 %v566_v44, %v485_v41  ;;  %v638_v43 = vrot.slane %v1097_v35, %v1351_v9  ;;  %v1098_v44 = vld [vmem:[%s1584_s1 + $0x3] ss:$8 sm:$0x3] }
 0x178   : > { %679 = vst [vmem:[#allocation2 + $0x8] sm:$0x3] %v569_v45  ;;  %v570_v47 = vmax.f32 %v567_v46, 0.0  ;;  %709 = vrot.lane.b32.xlu0 %v569_v45, %s1233_s10  ;;  %681 = vrot.lane.b32.xlu1 %v569_v45, %s1234_s11 }
 0x17a   : > { %680 = vst [vmem:[#allocation2] sm:$0x3] %v570_v47 }
 0x17c   : > { %737 = vrot.lane.b32.xlu0 %v569_v45, %s1235_s12  ;;  %683 = vrot.lane.b32.xlu1 %v570_v47, %s1234_s11  ;;  %s1018_s11 = sshll.u32 %s218_s30, 4  ;;  %s1019_s11 = int_to_ptr.vmem [resolvable:$true] %s1018_s11 }
 0x180   : > { %765 = vrot.lane.b32.xlu0 %v569_v45, %s1236_s13  ;;  %711 = vrot.lane.b32.xlu1 %v570_v47, %s1233_s10 }
 0x184   : > { %595 = vrot.lane.b32.xlu0 %v569_v45, %s1237_s14  ;;  %739 = vrot.lane.b32.xlu1 %v570_v47, %s1235_s12  ;;  %s1016_s12 = scalar_lea.hbm %s1588_s5, %s1114_s26 }
 0x188   : > { %623 = vrot.lane.b32.xlu0 %v569_v45, %s1238_s15  ;;  %767 = vrot.lane.b32.xlu1 %v570_v47, %s1236_s13  ;;  %s1004_s13 = scalar_lea.sflag [#allocation5], %s216_s23 }
 0x18c   : > { %651 = vrot.lane.b32.xlu0 %v569_v45, %s1239_s16  ;;  %597 = vrot.lane.b32.xlu1 %v570_v47, %s1237_s14  ;;  %s1171_s14 = scalar_lea.vmem %s1019_s11, 256 }
 0x18d   : > { %p1172_p11 = scmp.ne.s32.totalorder %s1019_s11, %s1171_s14 }
 0x18f   : > { %p1173_p12 = pnand %p1172_p11, %p1312_p5 }
 0x190   : > { %573 = vrot.lane.b32.xlu0 %v569_v45, %s1241_s17  ;;  %625 = vrot.lane.b32.xlu1 %v570_v47, %s1238_s15  ;;  %s1243_s15 = smov [#allocation4]  }
 0x191   : > { %p1174_p13 = pneg %p1173_p12  ;;  %s1175_s22 = sshll.u32 %s1243_s15, 4  ;;  %s1176_s22 = int_to_ptr.vmem [resolvable:$false] %s1175_s22 }
 0x192   : > { %s1177_s7 = scalar_lea.vmem %s1176_s22, 512  ;;  %p1178_p0 = scmp.lt.s32.totalorder %s1019_s11, %s1176_s22 }
 0x193   : > { %p1179_p1 = scmp.lt.s32.totalorder %s1177_s7, %s1171_s14 }
 0x194   : > { %795 = vperm.xlu0 %1164, %v228_v2   ;;  %653 = vrot.lane.b32.xlu1 %v570_v47, %s1239_s16 }
 0x195   : > { %p1180_p2 = por %p1179_p1, %p1178_p0 }
 0x197   : > { %p1181_p3 = pnand %p1180_p2, %p1174_p13 }
 0x198   : > { %979 = vperm.xlu0 %1164, %v230_v48   ;;  %575 = vrot.lane.b32.xlu1 %v570_v47, %s1241_s17 }
 0x19c   : > { %890 = vperm.xlu1 %1165, %v229_v7  }
 0x1ea   : > { %v710_v50 = vpop.permute.xlu0 %709  ;;  %v682_v51 = vpop.permute.xlu1 %681 }
 0x1ee   : > { %v738_v55 = vpop.permute.xlu0 %737  ;;  %v684_v56 = vpop.permute.xlu1 %683 }
 0x1ef   : > { %v685_v57 = vsel %vm366_vm2, %v682_v51, %v684_v56  ;;  %v686_v58 = vsel %vm366_vm2, %v684_v56, %v682_v51 }
 0x1f0   : > { %v699_v59 = vmul.f32 %v692_v52, %v685_v57  ;;  %v700_v60 = vmul.f32 %v696_v53, %v686_v58  ;;  %v662_v52 = vrot.slane %v1098_v44, %v1349_v8  ;;  %v666_v53 = vrot.slane %v1098_v44, %v1351_v9 }
 0x1f2   : > { %v703_v0 = vrot.slane %v699_v59, 6  ;;  %v704_v1 = vrot.slane %v700_v60, 6  ;;  %v766_v3 = vpop.permute.xlu0 %765  ;;  %v712_v4 = vpop.permute.xlu1 %711 }
 0x1f3   : > { %v713_v5 = vsel %vm396_vm0, %v710_v50, %v712_v4  ;;  %v714_v6 = vsel %vm396_vm0, %v712_v4, %v710_v50  ;;  %v588_v4 = vrot.slane %v579_v54, %v1351_v9  ;;  %v1095_v9 = vld [vmem:[%s1585_s2 + $0x2] sm:$0x3] }
 0x1f4   : > { %707 = vst [vmem:[#allocation2 + $0x8] sm:$0xc] %v703_v0  ;;  %708 = vst [vmem:[#allocation2] sm:$0xc] %v704_v1  ;;  %v727_v10 = vmul.f32 %v720_v61, %v713_v5  ;;  %v728_v11 = vmul.f32 %v724_v62, %v714_v6 }
 0x1f6   : > { %v731_v15 = vrot.slane %v727_v10, 4  ;;  %v732_v16 = vrot.slane %v728_v11, 4  ;;  %v740_v17 = vpop.permute.xlu1 %739  ;;  %v596_v20 = vpop.permute.xlu0 %595 }
 0x1f7   : > { %v741_v18 = vsel %vm426_vm1, %v738_v55, %v740_v17  ;;  %v742_v19 = vsel %vm426_vm1, %v740_v17, %v738_v55  ;;  %v231_v17 = vld [vmem:[%s1587_s4 + $0x14] sm:$0xff] }
 0x1f8   : > { %735 = vst [vmem:[#allocation2 + $0x8] sm:$0x30] %v731_v15  ;;  %736 = vst [vmem:[#allocation2] sm:$0x30] %v732_v16  ;;  %v755_v21 = vmul.f32 %v748_v12, %v741_v18  ;;  %v756_v22 = vmul.f32 %v752_v13, %v742_v19  ;;  %986 = vperm.xlu1 %1165, %v231_v17  }
 0x1fa   : > { %v759_v26 = vrot.slane %v755_v21, 2  ;;  %v760_v27 = vrot.slane %v756_v22, 2  ;;  %v768_v28 = vpop.permute.xlu1 %767  ;;  %v624_v36 = vpop.permute.xlu0 %623 }
 0x1fb   : > { %v769_v29 = vsel %vm456_vm3, %v766_v3, %v768_v28  ;;  %v770_v30 = vsel %vm456_vm3, %v768_v28, %v766_v3  ;;  %v584_v3 = vrot.slane %v579_v54, %v1349_v8 }
 0x1fc   : > { %763 = vst [vmem:[#allocation2 + $0x8] sm:$0xc0] %v759_v26  ;;  %764 = vst [vmem:[#allocation2] sm:$0xc0] %v760_v27  ;;  %v783_v31 = vmul.f32 %v776_v23, %v769_v29  ;;  %v784_v32 = vmul.f32 %v780_v24, %v770_v30  ;;  %v886_v29 = vld [vmem:[%s1586_s3] sm:$0xff] }
 0x1fe   : > { %785 = vst [vmem:[#allocation2 + $0x18] sm:$0x3] %v783_v31  ;;  %786 = vst [vmem:[#allocation2 + $0x20] sm:$0x3] %v784_v32  ;;  %v598_v37 = vpop.permute.xlu1 %597  ;;  %v652_v49 = vpop.permute.xlu0 %651 }
 0x1ff   : > { %v599_v38 = vsel %vm274_vm4, %v596_v20, %v598_v37  ;;  %v600_v39 = vsel %vm274_vm4, %v598_v37, %v596_v20 }
 0x200   : > { %v613_v40 = vmul.f32 %v606_v33, %v600_v39  ;;  %v614_v41 = vmul.f32 %v610_v34, %v599_v38 }
 0x202   : > { %v617_v45 = vrot.slane %v613_v40, 6  ;;  %v618_v46 = vrot.slane %v614_v41, 6  ;;  %v626_v47 = vpop.permute.xlu1 %625  ;;  %v574_v5 = vpop.permute.xlu0 %573 }
 0x203   : > { %v627_v2 = vsel %vm304_vm5, %v624_v36, %v626_v47  ;;  %v628_v48 = vsel %vm304_vm5, %v626_v47, %v624_v36  ;;  %v790_v62 = vld [vmem:[#allocation2] sm:$0xff]  ;;  %v789_v1 = vld [vmem:[#allocation2 + $0x8] sm:$0xff] }
 0x204   : > { %621 = vst [vmem:[#allocation2 + $0x28] sm:$0xc] %v617_v45  ;;  %622 = vst [vmem:[#allocation2 + $0x10] sm:$0xc] %v618_v46  ;;  %v641_v50 = vmul.f32 %v634_v42, %v628_v48  ;;  %v642_v51 = vmul.f32 %v638_v43, %v627_v2 }
 0x205   : > { %v792_v55 = vld [vmem:[#allocation2 + $0x20] sm:$0x3]  ;;  %v791_v56 = vld [vmem:[#allocation2 + $0x18] sm:$0x3] }
 0x206   : > { %v645_v57 = vrot.slane %v641_v50, 4  ;;  %v646_v58 = vrot.slane %v642_v51, 4  ;;  %1103 = vmatprep.subr.msk.mxu1 %vm491_vm6, %v792_v55  ;;  %v654_v59 = vpop.permute.xlu1 %653 }
 0x207   : > { %v655_v60 = vsel %vm334_vm7, %v652_v49, %v654_v59  ;;  %v656_v61 = vsel %vm334_vm7, %v654_v59, %v652_v49  ;;  %1104 = vmatpush1.msk.msra.mxu1 %vm491_vm6, %v791_v56 }
 0x208   : > { %649 = vst [vmem:[#allocation2 + $0x28] sm:$0x30] %v645_v57  ;;  %650 = vst [vmem:[#allocation2 + $0x10] sm:$0x30] %v646_v58  ;;  %v669_v63 = vmul.f32 %v662_v52, %v656_v61  ;;  %v670_v0 = vmul.f32 %v666_v53, %v655_v60  ;;  %835 = vmatprep.subr.mxu1 %v790_v62 }
 0x209   : > { %836 = vmatpush1.msra.mxu1 %v789_v1 }
 0x20a   : > { %v673_v6 = vrot.slane %v669_v63, 2  ;;  %v674_v10 = vrot.slane %v670_v0, 2  ;;  %v576_v11 = vpop.permute.xlu1 %575 }
 0x20b   : > { %v577_v12 = vsel %vm251_vm8, %v574_v5, %v576_v11  ;;  %v578_v13 = vsel %vm251_vm8, %v576_v11, %v574_v5 }
 0x20c   : > { %677 = vst [vmem:[#allocation2 + $0x28] sm:$0xc0] %v673_v6  ;;  %678 = vst [vmem:[#allocation2 + $0x10] sm:$0xc0] %v674_v10  ;;  %v591_v14 = vmul.f32 %v584_v3, %v578_v13  ;;  %v592_v15 = vmul.f32 %v588_v4, %v577_v12 }
 0x20e   : > { %593 = vst [vmem:[#allocation2 + $0x28] sm:$0x3] %v591_v14  ;;  %594 = vst [vmem:[#allocation2 + $0x10] sm:$0x3] %v592_v15 }
 0x20f   : > { %v796_v18 = vpop.permute.xlu0 %795 }
 0x213   : > { %v980_v36 = vpop.permute.xlu0 %979 }
 0x215   : > { %v788_v8 = vld [vmem:[#allocation2 + $0x10] sm:$0xff]  ;;  %v787_v16 = vld [vmem:[#allocation2 + $0x28] sm:$0xff] }
 0x216   : > { %837 = vmatprep.subr.mxu1 %v788_v8 }
 0x217   : > { %838 = vmatpush1.msra.mxu1 %v787_v16  ;;  %v891_v30 = vpop.permute.xlu1 %890 }
 0x218   : > { %1105 = vmatmul.mubr.msk.f32.vlgmr.msra.gmra.mxu1 %vm487_vm9, %v1095_v9 }
 0x273   : > { %v987_v39 = vpop.permute.xlu1 %986 }
 0x2d8   : > { %v873_v19 = vpop.f32.mrf.mxu1 }
 0x2d9   : > { %v874_v20 = vadd.f32 %v873_v19, %v796_v18 }
 0x2da   : > { %v875_v21 = vpop.f32.mrf.mxu1 }
 0x2db   : > { %v876_v22 = vadd.f32 %v875_v21, %v796_v18  ;;  %v878_v23 = vmax.f32 %v874_v20, 0.0 }
 0x2dd   : > { %v879_v24 = vmax.f32 %v876_v22, 0.0 }
 0x2df   : > { %v882_v25 = vcombine.low %v878_v23, %v879_v24 }
 0x2e1   : > { %v883_v26 = vrot.slane %v882_v25, 6 }
 0x2e3   : > { %885 = vst [vmem:[#allocation3] sm:$0xcc] %v883_v26 }
 0x2ea   : > { %v887_v27 = vld [vmem:[#allocation3] sm:$0xff] }
 0x2eb   : > { %v894_v28 = vcombine.high %v887_v27, %v887_v27 }
 0x2ed   : > { %1106 = vmatprep.subr.msk.mxu0 %vm899_vm10, %v894_v28 }
 0x2ee   : > { %1107 = vmatpush1.msk.msra.mxu0 %vm899_vm10, %v887_v27 }
 0x2ef   : > { %1108 = vmatmul.mubr.msk.f32.vlgmr.msra.gmra.mxu0 %vm895_vm11, %v886_v29 }
 0x3af   : > { %v970_v31 = vpop.f32.mrf.mxu0 }
 0x3b0   : > { %v971_v32 = vadd.f32 %v970_v31, %v891_v30 }
 0x3b1   : > { %v972_v33 = vpop.f32.mrf.mxu0 }
 0x3b2   : > { %v975_v34 = vmax.f32 %v971_v32, 0.0  ;;  %v973_v35 = vadd.f32 %v972_v33, %v891_v30 }
 0x3b4   : > { %v976_v37 = vmax.f32 %v973_v35, 0.0  ;;  %v982_v38 = vmul.f32 %v980_v36, %v975_v34 }
 0x3b6   : > { %v983_v40 = vmul.f32 %v980_v36, %v976_v37  ;;  %v989_v41 = vadd.f32 %v987_v39, %v982_v38 }
 0x3b8   : > { %v990_v42 = vadd.f32 %v987_v39, %v983_v40  ;;  %v991_v43 = vmul.f32 0.5, %v989_v41 }
 0x3ba   : > { %v992_v44 = vmul.f32 0.5, %v990_v42  ;;  %1167 = vtanh.f32 %v991_v43 }
 0x3bc   : > { %1169 = vtanh.f32 %v992_v44 }
 0x3c7   : > { %v1168_v45 = vpop.eup %1167 }
 0x3c8   : > { %v995_v46 = vmul.f32 0.5, %v1168_v45 }
 0x3c9   : > { %v1170_v47 = vpop.eup %1169 }
 0x3ca   : > { %v996_v2 = vmul.f32 0.5, %v1170_v47  ;;  %v997_v48 = vadd.f32 0.5, %v995_v46 }
 0x3cc   : > { %v998_v49 = vadd.f32 0.5, %v996_v2  ;;  %v999_v50 = vmul.f32 %v997_v48, %v975_v34 }
 0x3ce   : > { %v1000_v51 = vmul.f32 %v998_v49, %v976_v37  ;;  %1001 = vst [vmem:[%s218_s30] sm:$0xff] %v999_v50 }
 0x3d0   : > { %1002 = vst [vmem:[%s218_s30 + $0x8] sm:$0xff] %v1000_v51 }
 0x3d1   : > { %1184 = shalt.err (!%p1181_p3)
}
 0x3d2   : > { %s1185_s16 = scalar_lea.hbm %s1016_s12, 256  ;;  %s1189_s9 = scalar_lea.hbm %s1588_s5, 512 }
 0x3d3   : > { %p1186_p4 = scmp.ne.s32.totalorder %s1016_s12, %s1185_s16  ;;  %p1190_p9 = scmp.lt.s32.totalorder %s1016_s12, %s1588_s5 }
 0x3d4   : > { %p1191_p10 = scmp.lt.s32.totalorder %s1189_s9, %s1185_s16 }
 0x3d5   : > { %p1187_p7 = pnand %p1186_p4, %p1312_p5 }
 0x3d6   : > { %p1192_p11 = por %p1191_p10, %p1190_p9 }
 0x3d7   : > { %p1188_p8 = pneg %p1187_p7 }
 0x3d9   : > { %p1193_p12 = pnand %p1192_p11, %p1188_p8 }
 0x3db   : > { %1196 = shalt.err (!%p1193_p12)
}
 0x3dc   : > { %1115 = dma.vmem_to_hbm [thread:$0]  (%p1312_p5), %s1019_s11, 256, %s1016_s12, %s1004_s13  }
 0x3dd PF: > { %p1121_p13 = scmp.ge.s32.totalorder %s1231_s21, 2  ;;  %s1030_s26 = sand.u32 1, %s1219_s18  }
 0x3de   : > { %s1031_s30 = scalar_lea.sflag [#allocation5], %s1030_s26 }
 0x3df   : > { %p1118_p0 = pnand %p1121_p13, %p1316_p6 }
 0x3e1   : > { %p1119_p1 = pneg %p1118_p0 }
 0x3e3   : > { %1214 = dma.done.wait (%p1119_p1), %s1031_s30, 256  }
 0x3e4   : > { %1216 = vsyncadd (%p1119_p1), %s1031_s30, 4294967040  ;;  %p15_p2 = scmp.ge.s32.totalorder %s1299_s24, 4   ;;  %s1591_s18 = smov %s1223_s19 }
 0x3e5   : > { %s1592_s19 = smov %s1227_s20  ;;  %s1593_s20 = smov %s1310_s27 }
 0x3e6   : > { %s1594_s21 = smov %s1299_s24  ;;  %17 = sbr.rel (!%p15_p2) target bundleno = 3 (0x3), region = 83 }
 0x3eb   :  { %1036 = vsyncpa [#allocation5], 1 }
 0x3ec   :  { %1038 = vsyncpa [#allocation5 + $0x1], 1 }

</bundles_post_ra>
